<compile_context>
chip_gen: v5e
topology: v5e:2x2
jax: 0.10.0
libtpu: 0.0.40
codegen_flags: <defaults>
</compile_context>

<pallas_src>
import functools

import jax
import jax.numpy as jnp
from jax.experimental import pallas as pl
from jax.experimental.pallas import tpu as pltpu


def _round_up(x: int, m: int) -> int:
    return (x + m - 1) // m * m


def _mixup_loss_kernel(scal_ref, za_ref, zc_ref, out_ref,
                       m_scr, s_scr, dg_scr, *, true_b: int, class_padded: bool):
    # scal_ref: SMEM float32[2] = [lam, 1/tau]
    lam = scal_ref[0]
    inv_tau = scal_ref[1]

    tm = za_ref.shape[0]            # query rows in this tile (lanes of logits)
    tc = zc_ref.shape[0]            # class rows in this chunk (sublanes)
    i = pl.program_id(0)
    j = pl.program_id(1)
    nc = pl.num_programs(1)
    row0 = pl.multiple_of(i * tm, tm)     # first global query row of the tile
    col0 = pl.multiple_of(j * tc, tc)     # first global class column of chunk

    @pl.when(j == 0)
    def _():
        m_scr[...] = jnp.full_like(m_scr, -1e30)
        s_scr[...] = jnp.zeros_like(s_scr)
        dg_scr[...] = jnp.zeros_like(dg_scr)

    # Fold the temperature into the (small) z_aug tile; MXU operands keep the
    # input dtype.  (For sub-f32 inputs this quantizes 1/tau slightly -- apply
    # it to the f32 logits instead if tighter accuracy is required.)
    za = za_ref[...]
    za_s = za * inv_tau.astype(za.dtype)

    # Logits chunk, transposed: class rows -> sublanes, query rows -> lanes.
    dn = (((1,), (1,)), ((), ()))         # contract the feature axes directly
    l = jax.lax.dot_general(zc_ref[...], za_s, dimension_numbers=dn,
                            preferred_element_type=jnp.float32)     # (Tc, Tm)

    gcol = col0 + jax.lax.broadcasted_iota(jnp.int32, (tc, 1), 0)   # global class id

    # ---- label (diagonal) term: lam * l[g, g] + (1-lam) * l[B+g, g] ---------
    # Only chunks that can overlap one of the two diagonals do any work.
    d1_lo, d1_hi = row0, row0 + tm
    d2_lo, d2_hi = true_b + row0, true_b + row0 + tm
    overlap = jnp.logical_or(
        jnp.logical_and(col0 < d1_hi, col0 + tc > d1_lo),
        jnp.logical_and(col0 < d2_hi, col0 + tc > d2_lo))

    @pl.when(overlap)
    def _():
        grow = row0 + jax.lax.broadcasted_iota(jnp.int32, (1, tm), 1)
        w = (lam * (gcol == grow).astype(jnp.float32)
             + (1.0 - lam) * (gcol == grow + true_b).astype(jnp.float32))
        dg_scr[...] += jnp.sum(l * w, axis=0, keepdims=True)

    # ---- online max / log-sum-exp over the class (sublane) axis -------------
    if class_padded:   # static: only the last chunk carries padded class rows
        l = jnp.where(gcol < 2 * true_b, l, jnp.float32(-1e30))

    m_prev = m_scr[...]
    m_new = jnp.maximum(m_prev, jnp.max(l, axis=0, keepdims=True))
    s_scr[...] = (s_scr[...] * jnp.exp(m_prev - m_new)
                  + jnp.sum(jnp.exp(l - m_new), axis=0, keepdims=True))
    m_scr[...] = m_new

    @pl.when(j == nc - 1)
    def _():
        # loss_r = -(lam*d1 + (1-lam)*d2) + m + log(s), lane-dense (1, Tm).
        out_ref[...] = (m_scr[...] + jnp.log(s_scr[...]) - dg_scr[...]
                        ).astype(out_ref.dtype)


def mixup_loss(z_aug, z_1, z_2, lam, tau, *, block_rows=128, block_cols=512):
    """Pallas implementation of MixUpLoss.forward. Returns a scalar float32."""
    B, D = z_aug.shape
    assert z_1.shape == (B, D) and z_2.shape == (B, D)
    assert block_rows % 128 == 0 and block_cols % 128 == 0

    # Query-row tiling: rows become the lane axis of the transposed logits,
    # so the tile is a multiple of 128 (also gives >=2 grid steps for v7x's
    # two TensorCores whenever B > 128; tm=128 is also v5e-friendly).
    tm = min(block_rows, _round_up(B, 128))
    b_pad = _round_up(B, tm)
    # Class (2B) tiling: decoupled from the row-tile padding.
    C = 2 * B
    tc = min(block_cols, _round_up(C, 128))
    c_pad = _round_up(C, tc)
    d_pad = _round_up(max(D, 128), 128)

    dt = z_aug.dtype
    za_p = jnp.pad(z_aug, ((0, b_pad - B), (0, d_pad - D)))
    zcat = jnp.concatenate([z_1, z_2], axis=0).astype(dt)   # single RHS
    zc_p = jnp.pad(zcat, ((0, c_pad - C), (0, d_pad - D)))

    scal = jnp.stack([jnp.asarray(lam, jnp.float32),
                      1.0 / jnp.asarray(tau, jnp.float32)])

    # VMEM budget (chunked -> independent of B): double-buffered tiles + f32
    # logits/exp temporaries.  Clamp to ~85% of the physical VMEM of the part.
    itemsize = jnp.dtype(dt).itemsize
    est = (2 * tm * d_pad * itemsize       # z_aug tile   (double-buffered)
           + 2 * tc * d_pad * itemsize     # zcat chunk   (double-buffered)
           + 4 * tc * tm * 4               # f32 logits / exp temporaries
           + 2 * tm * 4                    # lane-dense output block
           + 3 * tm * 4 + (1 << 16))       # scratch + slack
    try:
        cap = int(pltpu.get_tpu_info().vmem_capacity_bytes)
    except Exception:
        cap = 64 * 1024 * 1024             # conservative (v7x per-core VMEM)
    vmem_limit = int(min(cap * 0.85, max(32 * 1024 * 1024, 2 * est)))

    grid = (b_pad // tm, c_pad // tc)      # rows parallel, class chunks last

    per_row = pl.pallas_call(
        functools.partial(_mixup_loss_kernel, true_b=B,
                          class_padded=(c_pad > C)),
        out_shape=jax.ShapeDtypeStruct((1, b_pad), jnp.float32),
        grid=grid,
        in_specs=[
            pl.BlockSpec(memory_space=pltpu.MemorySpace.SMEM),    # [lam, 1/tau]
            pl.BlockSpec((tm, d_pad), lambda i, j: (i, 0)),       # z_aug tile
            pl.BlockSpec((tc, d_pad), lambda i, j: (j, 0)),       # zcat chunk
        ],
        out_specs=pl.BlockSpec((1, tm), lambda i, j: (0, i)),     # lane-dense
        scratch_shapes=[pltpu.VMEM((1, tm), jnp.float32),         # running max
                        pltpu.VMEM((1, tm), jnp.float32),         # running sum
                        pltpu.VMEM((1, tm), jnp.float32)],        # diag accum
        compiler_params=pltpu.CompilerParams(
            dimension_semantics=("parallel", "arbitrary"),
            vmem_limit_bytes=vmem_limit),
    )(scal, za_p, zc_p)

    # Final mean over the TRUE batch rows only (padded query rows sliced off).
    return jnp.mean(per_row[0, :B])


def _mixup_loss_ref(z_aug, z_1, z_2, lam, tau):
    """Pure-JAX reference mirroring the PyTorch code literally."""
    B = z_aug.shape[0]
    eye = jnp.eye(B, dtype=jnp.float32)
    labels = jnp.concatenate([lam * eye, (1.0 - lam) * eye], axis=1)
    logits = jnp.concatenate([z_aug @ z_1.T, z_aug @ z_2.T], axis=1) / tau
    logp = jax.nn.log_softmax(logits, axis=1)
    return jnp.mean(jnp.sum(-labels * logp, axis=1))


if __name__ == "__main__":
    # MixUpLoss has no learnable parameters; tau comes from args -> fixed here.
    TAU = 0.5

    key = jax.random.PRNGKey(0)

    # Small case: single row tile, single class chunk.
    B, D = 8, 32
    k1, k2, k3, key = jax.random.split(key, 4)
    z_aug = jax.random.normal(k1, (B, D), dtype=jnp.float32)
    z_1 = jax.random.normal(k2, (B, D), dtype=jnp.float32)
    z_2 = jax.random.normal(k3, (B, D), dtype=jnp.float32)

    loss = jax.block_until_ready(mixup_loss(z_aug, z_1, z_2, 0.3, TAU))
    ref = _mixup_loss_ref(z_aug, z_1, z_2, 0.3, TAU)
    assert jnp.allclose(loss, ref, rtol=5e-3, atol=5e-3), (loss, ref)

    # Multi-tile case: exercises the online LSE across several class chunks,
    # the diagonal-overlap gating and both row / class padding paths.
    B2, D2 = 200, 64
    k1, k2, k3, key = jax.random.split(key, 4)
    z_aug2 = jax.random.normal(k1, (B2, D2), dtype=jnp.float32)
    z_12 = jax.random.normal(k2, (B2, D2), dtype=jnp.float32)
    z_22 = jax.random.normal(k3, (B2, D2), dtype=jnp.float32)

    loss2 = jax.block_until_ready(
        mixup_loss(z_aug2, z_12, z_22, 0.7, TAU, block_rows=128, block_cols=128))
    ref2 = _mixup_loss_ref(z_aug2, z_12, z_22, 0.7, TAU)
    assert jnp.allclose(loss2, ref2, rtol=5e-3, atol=5e-3), (loss2, ref2)

    print("KERNEL_OK")
</pallas_src>

<mosaic_0001>
module attributes {stable_mosaic.version = 11 : i64} {
  func.func @_mixup_loss_kernel(%arg0: i32, %arg1: i32, %arg2: memref<2xf32, #tpu.memory_space<smem>>, %arg3: memref<128x128xf32, #tpu.memory_space<vmem>>, %arg4: memref<128x128xf32, #tpu.memory_space<vmem>>, %arg5: memref<1x128xf32, #tpu.memory_space<vmem>>, %arg6: memref<1x128xf32, #tpu.memory_space<vmem>>, %arg7: memref<1x128xf32, #tpu.memory_space<vmem>>, %arg8: memref<1x128xf32, #tpu.memory_space<vmem>>) attributes {dimension_semantics = [#tpu.dimension_semantics<parallel>, #tpu.dimension_semantics<arbitrary>], iteration_bounds = array<i64: 1, 1>, scalar_prefetch = 0 : i64, scratch_operands = 3 : i64, tpu.core_type = #tpu.core_type<tc>, window_params = [{transform_indices = @transform_0, window_bounds = array<i64: 2>}, {transform_indices = @transform_1, window_bounds = array<i64: 128, 128>}, {transform_indices = @transform_2, window_bounds = array<i64: 128, 128>}, {transform_indices = @transform_3, window_bounds = array<i64: 1, 128>}]} {
    %c0 = arith.constant 0 : index
    %0 = memref.load %arg2[%c0] : memref<2xf32, #tpu.memory_space<smem>>
    %c1 = arith.constant 1 : index
    %1 = memref.load %arg2[%c1] : memref<2xf32, #tpu.memory_space<smem>>
    %c128_i32 = arith.constant 128 : i32
    %2 = arith.muli %arg0, %c128_i32 : i32
    %3 = tpu.assume_multiple %2, 128 : i32
    %c128_i32_0 = arith.constant 128 : i32
    %4 = arith.muli %arg1, %c128_i32_0 : i32
    %5 = tpu.assume_multiple %4, 128 : i32
    %c0_i32 = arith.constant 0 : i32
    %6 = arith.cmpi eq, %arg1, %c0_i32 : i32
    %7 = arith.extui %6 : i1 to i32
    %c0_i32_1 = arith.constant 0 : i32
    %8 = arith.cmpi ne, %7, %c0_i32_1 : i32
    scf.if %8 {
      %cst_25 = arith.constant -1.000000e+30 : f32
      %57 = vector.broadcast %cst_25 : f32 to vector<1x128xf32>
      %c0_26 = arith.constant 0 : index
      %c0_27 = arith.constant 0 : index
      %58 = vector.load %arg6[%c0_26, %c0_27] : memref<1x128xf32, #tpu.memory_space<vmem>>, vector<1x128xf32>
      tpu.vector_store %arg6[%c0_26, %c0_27], %57 {strides = array<i32>} : memref<1x128xf32, #tpu.memory_space<vmem>>, vector<1x128xf32>,
      %cst_28 = arith.constant 0.000000e+00 : f32
      %59 = vector.broadcast %cst_28 : f32 to vector<1x128xf32>
      %c0_29 = arith.constant 0 : index
      %c0_30 = arith.constant 0 : index
      %60 = vector.load %arg7[%c0_29, %c0_30] : memref<1x128xf32, #tpu.memory_space<vmem>>, vector<1x128xf32>
      tpu.vector_store %arg7[%c0_29, %c0_30], %59 {strides = array<i32>} : memref<1x128xf32, #tpu.memory_space<vmem>>, vector<1x128xf32>,
      %cst_31 = arith.constant 0.000000e+00 : f32
      %61 = vector.broadcast %cst_31 : f32 to vector<1x128xf32>
      %c0_32 = arith.constant 0 : index
      %c0_33 = arith.constant 0 : index
      %62 = vector.load %arg8[%c0_32, %c0_33] : memref<1x128xf32, #tpu.memory_space<vmem>>, vector<1x128xf32>
      tpu.vector_store %arg8[%c0_32, %c0_33], %61 {strides = array<i32>} : memref<1x128xf32, #tpu.memory_space<vmem>>, vector<1x128xf32>,
    } else {
    }
    %c0_2 = arith.constant 0 : index
    %c0_3 = arith.constant 0 : index
    %9 = vector.load %arg3[%c0_2, %c0_3] : memref<128x128xf32, #tpu.memory_space<vmem>>, vector<128x128xf32>
    %10 = vector.broadcast %1 : f32 to vector<128x128xf32>
    %11 = arith.mulf %9, %10 : vector<128x128xf32>
    %c0_4 = arith.constant 0 : index
    %c0_5 = arith.constant 0 : index
    %12 = vector.load %arg4[%c0_4, %c0_5] : memref<128x128xf32, #tpu.memory_space<vmem>>, vector<128x128xf32>
    %cst = arith.constant dense<0.000000e+00> : vector<128x128xf32>
    %13 = tpu.matmul %12, %11, %cst {dimension_numbers = #tpu.dot_dimension_numbers<[1], [1], [0], [0], [0, 0, 1, 0], [], []>} : vector<128x128xf32>, vector<128x128xf32>, vector<128x128xf32> -> vector<128x128xf32>
    %14 = tpu.iota {dimensions = array<i32: 0>} : vector<128x1xi32>
    %15 = vector.broadcast %5 : i32 to vector<128x1xi32>
    %16 = arith.addi %15, %14 : vector<128x1xi32>
    %c128_i32_6 = arith.constant 128 : i32
    %17 = arith.addi %3, %c128_i32_6 : i32
    %c8_i32 = arith.constant 8 : i32
    %18 = arith.addi %c8_i32, %3 : i32
    %c8_i32_7 = arith.constant 8 : i32
    %19 = arith.addi %c8_i32_7, %3 : i32
    %c128_i32_8 = arith.constant 128 : i32
    %20 = arith.addi %19, %c128_i32_8 : i32
    %21 = arith.cmpi slt, %5, %17 : i32
    %c128_i32_9 = arith.constant 128 : i32
    %22 = arith.addi %5, %c128_i32_9 : i32
    %23 = arith.cmpi sgt, %22, %3 : i32
    %24 = arith.andi %21, %23 : i1
    %25 = arith.cmpi slt, %5, %20 : i32
    %c128_i32_10 = arith.constant 128 : i32
    %26 = arith.addi %5, %c128_i32_10 : i32
    %27 = arith.cmpi sgt, %26, %18 : i32
    %28 = arith.andi %25, %27 : i1
    %29 = arith.ori %24, %28 : i1
    %30 = arith.extui %29 : i1 to i32
    %c0_i32_11 = arith.constant 0 : i32
    %31 = arith.cmpi ne, %30, %c0_i32_11 : i32
    scf.if %31 {
      %57 = tpu.iota {dimensions = array<i32: 1>} : vector<1x128xi32>
      %58 = vector.broadcast %3 : i32 to vector<1x128xi32>
      %59 = arith.addi %58, %57 : vector<1x128xi32>
      %60 = vector.broadcast %16 : vector<128x1xi32> to vector<128x128xi32>
      %61 = vector.broadcast %59 : vector<1x128xi32> to vector<128x128xi32>
      %62 = arith.cmpi eq, %60, %61 : vector<128x128xi32>
      %63 = arith.extui %62 : vector<128x128xi1> to vector<128x128xi32>
      %64 = arith.sitofp %63 : vector<128x128xi32> to vector<128x128xf32>
      %65 = vector.broadcast %0 : f32 to vector<128x128xf32>
      %66 = arith.mulf %65, %64 : vector<128x128xf32>
      %cst_25 = arith.constant 1.000000e+00 : f32
      %67 = arith.subf %cst_25, %0 : f32
      %c8_i32_26 = arith.constant 8 : i32
      %68 = vector.broadcast %c8_i32_26 : i32 to vector<1x128xi32>
      %69 = arith.addi %59, %68 : vector<1x128xi32>
      %70 = vector.broadcast %16 : vector<128x1xi32> to vector<128x128xi32>
      %71 = vector.broadcast %69 : vector<1x128xi32> to vector<128x128xi32>
      %72 = arith.cmpi eq, %70, %71 : vector<128x128xi32>
      %73 = arith.extui %72 : vector<128x128xi1> to vector<128x128xi32>
      %74 = arith.sitofp %73 : vector<128x128xi32> to vector<128x128xf32>
      %75 = vector.broadcast %67 : f32 to vector<128x128xf32>
      %76 = arith.mulf %75, %74 : vector<128x128xf32>
      %77 = arith.addf %66, %76 : vector<128x128xf32>
      %c0_27 = arith.constant 0 : index
      %c0_28 = arith.constant 0 : index
      %78 = vector.load %arg8[%c0_27, %c0_28] : memref<1x128xf32, #tpu.memory_space<vmem>>, vector<1x128xf32>
      %79 = arith.mulf %13, %77 : vector<128x128xf32>
      %cst_29 = arith.constant dense<0.000000e+00> : vector<128xf32>
      %80 = vector.multi_reduction <add>, %79, %cst_29 [0] : vector<128x128xf32> to vector<128xf32>
      %81 = vector.shape_cast %80 : vector<128xf32> to vector<1x128xf32>
      %82 = arith.addf %78, %81 : vector<1x128xf32>
      %c0_30 = arith.constant 0 : index
      %c0_31 = arith.constant 0 : index
      %83 = vector.load %arg8[%c0_30, %c0_31] : memref<1x128xf32, #tpu.memory_space<vmem>>, vector<1x128xf32>
      tpu.vector_store %arg8[%c0_30, %c0_31], %82 {strides = array<i32>} : memref<1x128xf32, #tpu.memory_space<vmem>>, vector<1x128xf32>,
    } else {
    }
    %c16_i32 = arith.constant 16 : i32
    %32 = vector.broadcast %c16_i32 : i32 to vector<128x1xi32>
    %33 = arith.cmpi slt, %16, %32 : vector<128x1xi32>
    %cst_12 = arith.constant -1.000000e+30 : f32
    %34 = vector.shape_cast %33 : vector<128x1xi1> to vector<128x1xi1>
    %35 = vector.broadcast %34 : vector<128x1xi1> to vector<128x128xi1>
    %36 = vector.broadcast %cst_12 : f32 to vector<128x128xf32>
    %37 = arith.select %35, %13, %36 : vector<128x128xi1>, vector<128x128xf32>
    %c0_13 = arith.constant 0 : index
    %c0_14 = arith.constant 0 : index
    %38 = vector.load %arg6[%c0_13, %c0_14] : memref<1x128xf32, #tpu.memory_space<vmem>>, vector<1x128xf32>
    %cst_15 = arith.constant dense<0xFF800000> : vector<128xf32>
    %39 = vector.multi_reduction <maximumf>, %37, %cst_15 [0] : vector<128x128xf32> to vector<128xf32>
    %40 = vector.shape_cast %39 : vector<128xf32> to vector<1x128xf32>
    %41 = arith.maximumf %38, %40 : vector<1x128xf32>
    %c0_16 = arith.constant 0 : index
    %c0_17 = arith.constant 0 : index
    %42 = vector.load %arg7[%c0_16, %c0_17] : memref<1x128xf32, #tpu.memory_space<vmem>>, vector<1x128xf32>
    %43 = arith.subf %38, %41 : vector<1x128xf32>
    %44 = math.exp %43 : vector<1x128xf32>
    %45 = arith.mulf %42, %44 : vector<1x128xf32>
    %46 = vector.broadcast %41 : vector<1x128xf32> to vector<128x128xf32>
    %47 = arith.subf %37, %46 : vector<128x128xf32>
    %48 = math.exp %47 : vector<128x128xf32>
    %cst_18 = arith.constant dense<0.000000e+00> : vector<128xf32>
    %49 = vector.multi_reduction <add>, %48, %cst_18 [0] : vector<128x128xf32> to vector<128xf32>
    %50 = vector.shape_cast %49 : vector<128xf32> to vector<1x128xf32>
    %51 = arith.addf %45, %50 : vector<1x128xf32>
    %c0_19 = arith.constant 0 : index
    %c0_20 = arith.constant 0 : index
    %52 = vector.load %arg7[%c0_19, %c0_20] : memref<1x128xf32, #tpu.memory_space<vmem>>, vector<1x128xf32>
    tpu.vector_store %arg7[%c0_19, %c0_20], %51 {strides = array<i32>} : memref<1x128xf32, #tpu.memory_space<vmem>>, vector<1x128xf32>,
    %c0_21 = arith.constant 0 : index
    %c0_22 = arith.constant 0 : index
    %53 = vector.load %arg6[%c0_21, %c0_22] : memref<1x128xf32, #tpu.memory_space<vmem>>, vector<1x128xf32>
    tpu.vector_store %arg6[%c0_21, %c0_22], %41 {strides = array<i32>} : memref<1x128xf32, #tpu.memory_space<vmem>>, vector<1x128xf32>,
    %c0_i32_23 = arith.constant 0 : i32
    %54 = arith.cmpi eq, %arg1, %c0_i32_23 : i32
    %55 = arith.extui %54 : i1 to i32
    %c0_i32_24 = arith.constant 0 : i32
    %56 = arith.cmpi ne, %55, %c0_i32_24 : i32
    scf.if %56 {
      %c0_25 = arith.constant 0 : index
      %c0_26 = arith.constant 0 : index
      %57 = vector.load %arg6[%c0_25, %c0_26] : memref<1x128xf32, #tpu.memory_space<vmem>>, vector<1x128xf32>
      %c0_27 = arith.constant 0 : index
      %c0_28 = arith.constant 0 : index
      %58 = vector.load %arg7[%c0_27, %c0_28] : memref<1x128xf32, #tpu.memory_space<vmem>>, vector<1x128xf32>
      %59 = math.log %58 : vector<1x128xf32>
      %60 = arith.addf %57, %59 : vector<1x128xf32>
      %c0_29 = arith.constant 0 : index
      %c0_30 = arith.constant 0 : index
      %61 = vector.load %arg8[%c0_29, %c0_30] : memref<1x128xf32, #tpu.memory_space<vmem>>, vector<1x128xf32>
      %62 = arith.subf %60, %61 : vector<1x128xf32>
      %c0_31 = arith.constant 0 : index
      %c0_32 = arith.constant 0 : index
      %63 = vector.load %arg5[%c0_31, %c0_32] : memref<1x128xf32, #tpu.memory_space<vmem>>, vector<1x128xf32>
      tpu.vector_store %arg5[%c0_31, %c0_32], %62 {strides = array<i32>} : memref<1x128xf32, #tpu.memory_space<vmem>>, vector<1x128xf32>,
    } else {
    }
    return
  }
  func.func @transform_0(%arg0: i32, %arg1: i32) -> i32 {
    %c0_i32 = arith.constant 0 : i32
    %c0_i32_0 = arith.constant 0 : i32
    return %c0_i32 : i32
  }
  func.func @transform_1(%arg0: i32, %arg1: i32) -> (i32, i32) {
    %c0_i32 = arith.constant 0 : i32
    %c0_i32_0 = arith.constant 0 : i32
    return %arg0, %c0_i32 : i32, i32
  }
  func.func @transform_2(%arg0: i32, %arg1: i32) -> (i32, i32) {
    %c0_i32 = arith.constant 0 : i32
    %c0_i32_0 = arith.constant 0 : i32
    return %arg1, %c0_i32 : i32, i32
  }
  func.func @transform_3(%arg0: i32, %arg1: i32) -> (i32, i32) {
    %c0_i32 = arith.constant 0 : i32
    %c0_i32_0 = arith.constant 0 : i32
    return %c0_i32, %arg0 : i32, i32
  }
}

</mosaic_0001>

<bundles_post_ra>
// kernel: tpu_custom_call.1
= control target key start
LH: loop header
LB: loop body
LE: loop exit
PB: predicated region body
PF: predicated region fallthrough
CT: control target
= control target key end

     0   :  { %8 = vsyncpa [#allocation8], 0  ;;  %s1040_s0 = inlined_call_operand.hbm [shape: f32[2], index: 0, kind: input, shape index: {}]   ;;  %s1041_s1 = inlined_call_operand.hbm [shape: f32[128,128], index: 1, kind: input, shape index: {}]   ;;  %s1042_s2 = inlined_call_operand.hbm [shape: f32[128,128], index: 2, kind: input, shape index: {}]   ;;  %s1043_s3 = inlined_call_operand.hbm [shape: f32[1,128], index: 3, kind: output, shape index: {}]  }
   0x1   :  { %9 = vsyncpa [#allocation6], 0 }
   0x2   :  { %10 = vsyncpa [#allocation11], 0 }
   0x3   :  { %11 = vsyncpa [#allocation7], 0  ;;  %s17_s14 = sshll.u32 %s1040_s0, 4  ;;  %s25_s17 = sshll.u32 %s1041_s1, 4  ;;  %s18_s14 = int_to_ptr.hbm [resolvable:$true] %s17_s14  ;;  %s26_s17 = int_to_ptr.hbm [resolvable:$true] %s25_s17 }
   0x4   :  { %s814_s18 = smov [#allocation5]   ;;  %s815_s19 = smov [#allocation9]  }
   0x5   :  { %20 = dma.hbm_to_smem %s18_s14, 16, %s814_s18, [#allocation8]  }
   0x6   :  { %s27_s20 = sshll.u32 %s815_s19, 4  ;;  %s816_s21 = smov 128   ;;  %s28_s20 = int_to_ptr.vmem [resolvable:$true] %s27_s20 }
   0x7   :  { %s817_s22 = smov 8   ;;  %s38_s25 = sshll.u32 %s1042_s2, 4  ;;  %s39_s25 = int_to_ptr.hbm [resolvable:$true] %s38_s25 }
   0x8   :  { %33 = dma.hbm_to_vmem [thread:$0]  %s26_s17, 2048, %s28_s20, [#allocation6], %s816_s21, %s816_s21, %s817_s22  }
   0x9   :  { %s818_s0 = smov [#allocation10]  }
   0xa   :  { %s40_s26 = sshll.u32 %s818_s0, 4  ;;  %s41_s26 = int_to_ptr.vmem [resolvable:$true] %s40_s26 }
   0xb   :  { %46 = dma.hbm_to_vmem [thread:$0]  %s39_s25, 2048, %s41_s26, [#allocation11], %s816_s21, %s816_s21, %s817_s22  }
   0xc   :  { %806 = dma.done.wait [#allocation8], 16  }
   0xd   :  { %807 = vsyncadd [#allocation8], 4294967280 }
   0xe   :  { %808 = dma.done.wait [#allocation6], 2048  }
   0xf   :  { %809 = vsyncadd [#allocation6], 4294965248 }
  0x10   :  { %810 = dma.done.wait [#allocation11], 2048  }
  0x11   :  { %811 = vsyncadd [#allocation11], 4294965248 }
  0x12   :  { %59 = sfence }
  0x13   :  { %s624_s1 = sld [smem:[#allocation5 + $0x1]]  ;;  %v86_v0 = vld [vmem:[#allocation9 + $0x78] sm:$0xff]  ;;  %v85_v2 = vld [vmem:[#allocation9 + $0x70] sm:$0xff]  ;;  %v84_v5 = vld [vmem:[#allocation9 + $0x68] sm:$0xff]  ;;  %v819_v33 = vmov 0.0   ;;  %v185_v51 = vlaneseq  ;;  %s821_s28 = smov [#allocation12]  }
  0x14   :  { %v83_v7 = vld [vmem:[#allocation9 + $0x60] sm:$0xff]  ;;  %v82_v9 = vld [vmem:[#allocation9 + $0x58] sm:$0xff]  ;;  %v81_v11 = vld [vmem:[#allocation9 + $0x50] sm:$0xff]  ;;  %69 = vst [vmem:[#allocation3] sm:$0x1] %v819_v33  ;;  %s60_s2 = sld [smem:[#allocation5]] }
  0x15   :  { %v80_v13 = vld [vmem:[#allocation9 + $0x48] sm:$0xff]  ;;  %v79_v15 = vld [vmem:[#allocation9 + $0x40] sm:$0xff]  ;;  %v78_v17 = vld [vmem:[#allocation9 + $0x38] sm:$0xff]  ;;  %70 = vst [vmem:[#allocation4] sm:$0x1] %v819_v33  ;;  %v871_v52 = vshrl.u32 %v185_v51, 7 }
  0x16   :  { %v77_v19 = vld [vmem:[#allocation9 + $0x30] sm:$0xff]  ;;  %v76_v21 = vld [vmem:[#allocation9 + $0x28] sm:$0xff]  ;;  %v75_v23 = vld [vmem:[#allocation9 + $0x20] sm:$0xff]  ;;  %v820_v50 = vmov -1e+30   ;;  %v873_v53 = vand.u32 127, %v185_v51 }
  0x17   :  { %v74_v25 = vld [vmem:[#allocation9 + $0x18] sm:$0xff]  ;;  %v73_v27 = vld [vmem:[#allocation9 + $0x10] sm:$0xff]  ;;  %v72_v29 = vld [vmem:[#allocation9 + $0x8] sm:$0xff]  ;;  %68 = vst [vmem:[#allocation2] sm:$0x1] %v820_v50  ;;  %v187_v54 = vadd.s32 8, %v871_v52 }
  0x18   :  { %v71_v31 = vld [vmem:[#allocation9] sm:$0xff]  ;;  %v105_v38 = vld [vmem:[#allocation10 + $0x8] sm:$0xff]  ;;  %v106_v42 = vld [vmem:[#allocation10 + $0x10] sm:$0xff]  ;;  %vm239_vm0 = vcmp.eq.s32.totalorder %v871_v52, %v873_v53  ;;  %v879_v55 = vadd.s32 8, %v873_v53  ;;  %v188_v59 = vadd.s32 16, %v871_v52  ;;  %v189_v60 = vadd.s32 24, %v871_v52 }
  0x19   :  { %v851_v1 = vstv %s624_s1  ;;  %v104_v34 = vld [vmem:[#allocation10] sm:$0xff]  ;;  %v109_v39 = vld [vmem:[#allocation10 + $0x28] sm:$0xff]  ;;  %v110_v43 = vld [vmem:[#allocation10 + $0x30] sm:$0xff]  ;;  %v625_v56 = vsel %vm239_vm0, 1.0, %v819_v33  ;;  %vm240_vm1 = vcmp.eq.s32.totalorder %v187_v54, %v873_v53  ;;  %v196_v50 = vadd.s32 80, %v871_v52  ;;  %s610_s29 = sshll.u32 %s821_s28, 4  ;;  %s611_s29 = int_to_ptr.vmem [resolvable:$true] %s610_s29 }
  0x1a   :  { %v103_v3 = vmul.f32 %v851_v1, %v86_v0  ;;  %v102_v4 = vmul.f32 %v851_v1, %v85_v2  ;;  %v101_v6 = vmul.f32 %v851_v1, %v84_v5  ;;  %v100_v8 = vmul.f32 %v851_v1, %v83_v7  ;;  %v108_v35 = vld [vmem:[#allocation10 + $0x20] sm:$0xff]  ;;  %v113_v40 = vld [vmem:[#allocation10 + $0x48] sm:$0xff]  ;;  %v114_v44 = vld [vmem:[#allocation10 + $0x50] sm:$0xff]  ;;  %s304_s27 = ssub.f32 1.0, %s60_s2  ;;  %s612_s5 = sshll.u32 %s1043_s3, 4  ;;  %s613_s5 = int_to_ptr.hbm [resolvable:$true] %s612_s5 }
  0x1b   :  { %v99_v10 = vmul.f32 %v851_v1, %v82_v9  ;;  %v98_v12 = vmul.f32 %v851_v1, %v81_v11  ;;  %v97_v14 = vmul.f32 %v851_v1, %v80_v13  ;;  %v96_v16 = vmul.f32 %v851_v1, %v79_v15  ;;  %v112_v36 = vld [vmem:[#allocation10 + $0x40] sm:$0xff]  ;;  %v117_v41 = vld [vmem:[#allocation10 + $0x68] sm:$0xff]  ;;  %v118_v45 = vld [vmem:[#allocation10 + $0x70] sm:$0xff] }
  0x1c   :  { %120 = vmatpush.xpose.msra.mxu0 %v103_v3  ;;  %656 = vmatpush.xpose.msra.mxu1 %v103_v3  ;;  %v95_v18 = vmul.f32 %v851_v1, %v78_v17  ;;  %v94_v20 = vmul.f32 %v851_v1, %v77_v19  ;;  %v93_v22 = vmul.f32 %v851_v1, %v76_v21  ;;  %v116_v37 = vld [vmem:[#allocation10 + $0x60] sm:$0xff]  ;;  %v107_v46 = vld [vmem:[#allocation10 + $0x18] sm:$0xff]  ;;  %v882_v57 = vstv %s60_s2 }
  0x1d   :  { %657 = vmatpush.xpose.msra.mxu2 %v103_v3  ;;  %658 = vmatpush.xpose.msra.mxu3 %v103_v3  ;;  %v92_v24 = vmul.f32 %v851_v1, %v75_v23  ;;  %v91_v26 = vmul.f32 %v851_v1, %v74_v25  ;;  %v90_v28 = vmul.f32 %v851_v1, %v73_v27  ;;  %v111_v47 = vld [vmem:[#allocation10 + $0x38] sm:$0xff]  ;;  %v884_v58 = vstv %s304_s27 }
  0x1e   :  { %v89_v30 = vmul.f32 %v851_v1, %v72_v29  ;;  %v88_v32 = vmul.f32 %v851_v1, %v71_v31  ;;  %v115_v48 = vld [vmem:[#allocation10 + $0x58] sm:$0xff]  ;;  %vm307_vm2 = vcmp.eq.s32.totalorder %v187_v54, %v879_v55  ;;  %v288_v61 = vmul.f32 %v625_v56, %v882_v57 }
  0x1f   :  { %v119_v49 = vld [vmem:[#allocation10 + $0x78] sm:$0xff]  ;;  %v355_v62 = vmul.f32 0.0, %v884_v58  ;;  %v626_v0 = vsel %vm240_vm1, 1.0, %v819_v33  ;;  %v641_v1 = vsel %vm307_vm2, 1.0, %v819_v33  ;;  %v190_v3 = vadd.s32 32, %v871_v52 }
  0x20   :  { %121 = vmatpush.xpose.msra.mxu0 %v102_v4  ;;  %659 = vmatpush.xpose.msra.mxu1 %v102_v4  ;;  %vm241_vm3 = vcmp.eq.s32.totalorder %v188_v59, %v873_v53  ;;  %vm308_vm4 = vcmp.eq.s32.totalorder %v188_v59, %v879_v55  ;;  %vm242_vm5 = vcmp.eq.s32.totalorder %v189_v60, %v873_v53  ;;  %v192_v5 = vadd.s32 48, %v871_v52 }
  0x21   :  { %660 = vmatpush.xpose.msra.mxu2 %v102_v4  ;;  %661 = vmatpush.xpose.msra.mxu3 %v102_v4  ;;  %v191_v4 = vadd.s32 40, %v871_v52  ;;  %v289_v7 = vmul.f32 %v626_v0, %v882_v57  ;;  %v627_v9 = vsel %vm241_vm3, 1.0, %v819_v33  ;;  %vm243_vm6 = vcmp.eq.s32.totalorder %v190_v3, %v873_v53 }
  0x22   :  { %vm310_vm7 = vcmp.eq.s32.totalorder %v190_v3, %v879_v55  ;;  %vm309_vm8 = vcmp.eq.s32.totalorder %v189_v60, %v879_v55  ;;  %v290_v13 = vmul.f32 %v627_v9, %v882_v57  ;;  %vm245_vm11 = vcmp.eq.s32.totalorder %v192_v5, %v873_v53 }
  0x23   :  { %vm244_vm9 = vcmp.eq.s32.totalorder %v191_v4, %v873_v53  ;;  %vm311_vm10 = vcmp.eq.s32.totalorder %v191_v4, %v879_v55  ;;  %vm312_vm12 = vcmp.eq.s32.totalorder %v192_v5, %v879_v55  ;;  %v629_v15 = vsel %vm243_vm6, 1.0, %v819_v33 }
  0x24   :  { %122 = vmatpush.xpose.msra.mxu0 %v101_v6  ;;  %662 = vmatpush.xpose.msra.mxu1 %v101_v6  ;;  %v643_v19 = vsel %vm309_vm8, 1.0, %v819_v33  ;;  %v645_v23 = vsel %vm311_vm10, 1.0, %v819_v33  ;;  %v646_v29 = vsel %vm312_vm12, 1.0, %v819_v33  ;;  %vm316_vm6 = vcmp.eq.s32.totalorder %v196_v50, %v879_v55 }
  0x25   :  { %663 = vmatpush.xpose.msra.mxu2 %v101_v6  ;;  %664 = vmatpush.xpose.msra.mxu3 %v101_v6  ;;  %v371_v6 = vadd.f32 %v355_v62, %v288_v61 }
  0x28   :  { %123 = vmatpush.xpose.msra.mxu0 %v100_v8  ;;  %665 = vmatpush.xpose.msra.mxu1 %v100_v8 }
  0x29   :  { %666 = vmatpush.xpose.msra.mxu2 %v100_v8  ;;  %667 = vmatpush.xpose.msra.mxu3 %v100_v8  ;;  %v356_v8 = vmul.f32 %v641_v1, %v884_v58 }
  0x2c   :  { %124 = vmatpush.xpose.msra.mxu0 %v99_v10  ;;  %668 = vmatpush.xpose.msra.mxu1 %v99_v10 }
  0x2d   :  { %669 = vmatpush.xpose.msra.mxu2 %v99_v10  ;;  %670 = vmatpush.xpose.msra.mxu3 %v99_v10  ;;  %v642_v10 = vsel %vm308_vm4, 1.0, %v819_v33  ;;  %vm249_vm4 = vcmp.eq.s32.totalorder %v196_v50, %v873_v53 }
  0x2e   :  { %v357_v21 = vmul.f32 %v642_v10, %v884_v58 }
  0x30   :  { %125 = vmatpush.xpose.msra.mxu0 %v98_v12  ;;  %671 = vmatpush.xpose.msra.mxu1 %v98_v12 }
  0x31   :  { %672 = vmatpush.xpose.msra.mxu2 %v98_v12  ;;  %673 = vmatpush.xpose.msra.mxu3 %v98_v12  ;;  %v628_v12 = vsel %vm242_vm5, 1.0, %v819_v33 }
  0x34   :  { %126 = vmatpush.xpose.msra.mxu0 %v97_v14  ;;  %674 = vmatpush.xpose.msra.mxu1 %v97_v14 }
  0x35   :  { %675 = vmatpush.xpose.msra.mxu2 %v97_v14  ;;  %676 = vmatpush.xpose.msra.mxu3 %v97_v14  ;;  %v193_v14 = vadd.s32 56, %v871_v52 }
  0x37   :  { %vm246_vm13 = vcmp.eq.s32.totalorder %v193_v14, %v873_v53  ;;  %vm313_vm0 = vcmp.eq.s32.totalorder %v193_v14, %v879_v55 }
  0x38   :  { %127 = vmatpush.xpose.msra.mxu0 %v96_v16  ;;  %677 = vmatpush.xpose.msra.mxu1 %v96_v16  ;;  %v647_v3 = vsel %vm313_vm0, 1.0, %v819_v33 }
  0x39   :  { %678 = vmatpush.xpose.msra.mxu2 %v96_v16  ;;  %679 = vmatpush.xpose.msra.mxu3 %v96_v16  ;;  %v644_v16 = vsel %vm310_vm7, 1.0, %v819_v33 }
  0x3a   :  { %v359_v31 = vmul.f32 %v644_v16, %v884_v58 }
  0x3c   :  { %128 = vmatpush.xpose.msra.mxu0 %v95_v18  ;;  %680 = vmatpush.xpose.msra.mxu1 %v95_v18 }
  0x3d   :  { %681 = vmatpush.xpose.msra.mxu2 %v95_v18  ;;  %682 = vmatpush.xpose.msra.mxu3 %v95_v18  ;;  %v194_v18 = vadd.s32 64, %v871_v52 }
  0x3f   :  { %vm247_vm14 = vcmp.eq.s32.totalorder %v194_v18, %v873_v53  ;;  %vm314_vm15 = vcmp.eq.s32.totalorder %v194_v18, %v879_v55 }
  0x40   :  { %129 = vmatpush.xpose.msra.mxu0 %v94_v20  ;;  %683 = vmatpush.xpose.msra.mxu1 %v94_v20 }
  0x41   :  { %684 = vmatpush.xpose.msra.mxu2 %v94_v20  ;;  %685 = vmatpush.xpose.msra.mxu3 %v94_v20 }
  0x44   :  { %130 = vmatpush.xpose.msra.mxu0 %v93_v22  ;;  %686 = vmatpush.xpose.msra.mxu1 %v93_v22 }
  0x45   :  { %687 = vmatpush.xpose.msra.mxu2 %v93_v22  ;;  %688 = vmatpush.xpose.msra.mxu3 %v93_v22  ;;  %v630_v22 = vsel %vm244_vm9, 1.0, %v819_v33 }
  0x48   :  { %131 = vmatpush.xpose.msra.mxu0 %v92_v24  ;;  %689 = vmatpush.xpose.msra.mxu1 %v92_v24 }
  0x49   :  { %690 = vmatpush.xpose.msra.mxu2 %v92_v24  ;;  %691 = vmatpush.xpose.msra.mxu3 %v92_v24  ;;  %v291_v24 = vmul.f32 %v628_v12, %v882_v57  ;;  %v197_v12 = vadd.s32 88, %v871_v52 }
  0x4b   :  { %vm250_vm7 = vcmp.eq.s32.totalorder %v197_v12, %v873_v53  ;;  %vm317_vm8 = vcmp.eq.s32.totalorder %v197_v12, %v879_v55 }
  0x4c   :  { %132 = vmatpush.xpose.msra.mxu0 %v91_v26  ;;  %692 = vmatpush.xpose.msra.mxu1 %v91_v26 }
  0x4d   :  { %693 = vmatpush.xpose.msra.mxu2 %v91_v26  ;;  %694 = vmatpush.xpose.msra.mxu3 %v91_v26 }
  0x50   :  { %133 = vmatpush.xpose.msra.mxu0 %v90_v28  ;;  %695 = vmatpush.xpose.msra.mxu1 %v90_v28 }
  0x51   :  { %696 = vmatpush.xpose.msra.mxu2 %v90_v28  ;;  %697 = vmatpush.xpose.msra.mxu3 %v90_v28  ;;  %v631_v28 = vsel %vm245_vm11, 1.0, %v819_v33 }
  0x54   :  { %134 = vmatpush.xpose.msra.mxu0 %v89_v30  ;;  %698 = vmatpush.xpose.msra.mxu1 %v89_v30 }
  0x55   :  { %699 = vmatpush.xpose.msra.mxu2 %v89_v30  ;;  %700 = vmatpush.xpose.msra.mxu3 %v89_v30  ;;  %v292_v30 = vmul.f32 %v629_v15, %v882_v57 }
  0x57   :  { %v375_v51 = vadd.f32 %v359_v31, %v292_v30 }
  0x58   :  { %135 = vmatpush.xpose.msra.mxu0 %v88_v32  ;;  %701 = vmatpush.xpose.msra.mxu1 %v88_v32 }
  0x59   :  { %702 = vmatpush.xpose.msra.mxu2 %v88_v32  ;;  %703 = vmatpush.xpose.msra.mxu3 %v88_v32  ;;  %v358_v32 = vmul.f32 %v643_v19, %v884_v58 }
  0x5b   :  { %136 = vmatmul.f32.vlgmr.msra.gmra.mxu0 %v104_v34  ;;  %148 = vmatmul.f32.vlgmr.msra.gmra.mxu1 %v108_v35  ;;  %v195_v35 = vadd.s32 72, %v871_v52  ;;  %v374_v59 = vadd.f32 %v358_v32, %v291_v24  ;;  %v199_v24 = vadd.s32 104, %v871_v52 }
  0x5c   :  { %160 = vmatmul.f32.vlgmr.msra.gmra.mxu2 %v112_v36  ;;  %172 = vmatmul.f32.vlgmr.msra.gmra.mxu3 %v116_v37  ;;  %v293_v36 = vmul.f32 %v630_v22, %v882_v57  ;;  %v360_v37 = vmul.f32 %v645_v23, %v884_v58 }
  0x5d   :  { %vm248_vm1 = vcmp.eq.s32.totalorder %v195_v35, %v873_v53  ;;  %vm315_vm2 = vcmp.eq.s32.totalorder %v195_v35, %v879_v55  ;;  %vm252_vm9 = vcmp.eq.s32.totalorder %v199_v24, %v873_v53  ;;  %vm319_vm10 = vcmp.eq.s32.totalorder %v199_v24, %v879_v55 }
  0x5e   :  { %v376_v56 = vadd.f32 %v360_v37, %v293_v36  ;;  %v649_v15 = vsel %vm315_vm2, 1.0, %v819_v33 }
  0x63   :  { %139 = vmatmul.f32.gmra.mxu0 %v105_v38  ;;  %151 = vmatmul.f32.gmra.mxu1 %v109_v39  ;;  %v294_v38 = vmul.f32 %v631_v28, %v882_v57  ;;  %v361_v39 = vmul.f32 %v646_v29, %v884_v58  ;;  %v650_v29 = vsel %vm316_vm6, 1.0, %v819_v33 }
  0x64   :  { %163 = vmatmul.f32.gmra.mxu2 %v113_v40  ;;  %175 = vmatmul.f32.gmra.mxu3 %v117_v41  ;;  %v372_v41 = vadd.f32 %v356_v8, %v289_v7  ;;  %v634_v7 = vsel %vm248_vm1, 1.0, %v819_v33 }
  0x65   :  { %v377_v60 = vadd.f32 %v361_v39, %v294_v38  ;;  %v297_v18 = vmul.f32 %v634_v7, %v882_v57 }
  0x6b   :  { %142 = vmatmul.f32.gmra.mxu0 %v106_v42  ;;  %154 = vmatmul.f32.gmra.mxu1 %v110_v43  ;;  %v373_v43 = vadd.f32 %v357_v21, %v290_v13  ;;  %v635_v21 = vsel %vm249_vm4, 1.0, %v819_v33 }
  0x6c   :  { %166 = vmatmul.f32.gmra.mxu2 %v114_v44  ;;  %178 = vmatmul.f32.gmra.mxu3 %v118_v45  ;;  %v633_v44 = vsel %vm247_vm14, 1.0, %v819_v33  ;;  %v648_v45 = vsel %vm314_vm15, 1.0, %v819_v33  ;;  %v298_v38 = vmul.f32 %v635_v21, %v882_v57 }
  0x6d   :  { %v296_v4 = vmul.f32 %v633_v44, %v882_v57  ;;  %v363_v5 = vmul.f32 %v648_v45, %v884_v58  ;;  %v365_v44 = vmul.f32 %v650_v29, %v884_v58  ;;  %v651_v45 = vsel %vm317_vm8, 1.0, %v819_v33 }
  0x6f   :  { %v379_v16 = vadd.f32 %v363_v5, %v296_v4  ;;  %v366_v5 = vmul.f32 %v651_v45, %v884_v58  ;;  %v381_v7 = vadd.f32 %v365_v44, %v298_v38 }
  0x73   :  { %145 = vmatmul.f32.gmra.mxu0 %v107_v46  ;;  %157 = vmatmul.f32.gmra.mxu1 %v111_v47  ;;  %v632_v46 = vsel %vm246_vm13, 1.0, %v819_v33 }
  0x74   :  { %169 = vmatmul.f32.gmra.mxu2 %v115_v48  ;;  %181 = vmatmul.f32.gmra.mxu3 %v119_v49  ;;  %v198_v49 = vadd.s32 96, %v871_v52  ;;  %v295_v1 = vmul.f32 %v632_v46, %v882_v57 }
  0x76   :  { %vm251_vm3 = vcmp.eq.s32.totalorder %v198_v49, %v873_v53  ;;  %vm318_vm5 = vcmp.eq.s32.totalorder %v198_v49, %v879_v55 }
  0x77   :  { %v637_v19 = vsel %vm251_vm3, 1.0, %v819_v33  ;;  %v652_v23 = vsel %vm318_vm5, 1.0, %v819_v33 }
  0x78   :  { %v300_v36 = vmul.f32 %v637_v19, %v882_v57  ;;  %v367_v37 = vmul.f32 %v652_v23, %v884_v58 }
  0xd8   :  { %v892_v63 = vpop.f32.mrf.mxu0  ;;  %v896_v2 = vpop.f32.mrf.mxu1 }
  0xd9   :  { %v492_v11 = vmax.f32 %v892_v63, -1e+30  ;;  %v388_v61 = vmul.f32 %v371_v6, %v892_v63  ;;  %v392_v10 = vmul.f32 %v375_v51, %v896_v2  ;;  %v201_v51 = vadd.s32 120, %v871_v52 }
  0xdb   :  { %v496_v25 = vmax.f32 %v492_v11, -1e+30  ;;  %v362_v11 = vmul.f32 %v647_v3, %v884_v58  ;;  %v653_v3 = vsel %vm319_vm10, 1.0, %v819_v33  ;;  %vm254_vm13 = vcmp.eq.s32.totalorder %v201_v51, %v873_v53 }
  0xdc   :  { %vm321_vm14 = vcmp.eq.s32.totalorder %v201_v51, %v879_v55 }
  0xdd   :  { %v500_v40 = vmax.f32 %v496_v25, -1e+30  ;;  %v378_v28 = vadd.f32 %v362_v11, %v295_v1 }
  0xdf   :  { %v921_v17 = vpop.f32.mrf.mxu2  ;;  %v956_v48 = vpop.f32.mrf.mxu3 }
  0xe0   :  { %v925_v20 = vpop.f32.mrf.mxu0  ;;  %v932_v27 = vpop.f32.mrf.mxu1 }
  0xe1   :  { %v493_v26 = vmax.f32 %v925_v20, -1e+30  ;;  %v389_v8 = vmul.f32 %v372_v41, %v925_v20  ;;  %v393_v35 = vmul.f32 %v376_v56, %v932_v27  ;;  %v636_v27 = vsel %vm250_vm7, 1.0, %v819_v33 }
  0xe3   :  { %v497_v34 = vmax.f32 %v493_v26, -1e+30  ;;  %v404_v22 = vadd.f32 %v389_v8, %v388_v61  ;;  %v364_v26 = vmul.f32 %v649_v15, %v884_v58  ;;  %v638_v61 = vsel %vm252_vm9, 1.0, %v819_v33 }
  0xe4   :  { %v301_v8 = vmul.f32 %v638_v61, %v882_v57 }
  0xe5   :  { %v501_v42 = vmax.f32 %v497_v34, -1e+30  ;;  %v380_v56 = vadd.f32 %v364_v26, %v297_v18  ;;  %v640_v18 = vsel %vm254_vm13, 1.0, %v819_v33 }
  0xe7   :  { %v504_v47 = vmax.f32 %v500_v40, %v501_v42  ;;  %v961_v0 = vpop.f32.mrf.mxu2  ;;  %v988_v34 = vpop.f32.mrf.mxu3  ;;  %v200_v42 = vadd.s32 112, %v871_v52 }
  0xe8   :  { %v143_v54 = vpop.f32.mrf.mxu0  ;;  %v155_v9 = vpop.f32.mrf.mxu1  ;;  %v397_v15 = vmul.f32 %v380_v56, %v961_v0  ;;  %v303_v0 = vmul.f32 %v640_v18, %v882_v57 }
  0xe9   :  { %v506_v62 = vmax.f32 %v504_v47, -1e+30  ;;  %v390_v14 = vmul.f32 %v373_v43, %v143_v54  ;;  %v997_v43 = vld [vmem:[#allocation2] sm:$0x1]  ;;  %v394_v49 = vmul.f32 %v377_v60, %v155_v9  ;;  %v396_v54 = vmul.f32 %v379_v16, %v921_v17 }
  0xea   :  { %vm253_vm11 = vcmp.eq.s32.totalorder %v200_v42, %v873_v53  ;;  %v299_v60 = vmul.f32 %v636_v27, %v882_v57  ;;  %vm320_vm12 = vcmp.eq.s32.totalorder %v200_v42, %v879_v55  ;;  %v655_v55 = vsel %vm321_vm14, 1.0, %v819_v33 }
  0xeb   :  { %v507_v6 = vrot.slane %v506_v62, 4  ;;  %v405_v31 = vadd.f32 %v404_v22, %v390_v14  ;;  %v639_v9 = vsel %vm253_vm11, 1.0, %v819_v33  ;;  %v654_v14 = vsel %vm320_vm12, 1.0, %v819_v33 }
  0xec   :  { %v382_v53 = vadd.f32 %v366_v5, %v299_v60  ;;  %v302_v22 = vmul.f32 %v639_v9, %v882_v57  ;;  %v369_v24 = vmul.f32 %v654_v14, %v884_v58  ;;  %v370_v29 = vmul.f32 %v655_v55, %v884_v58 }
  0xed   :  { %v508_v13 = vmax.f32 %v506_v62, %v507_v6  ;;  %v368_v6 = vmul.f32 %v653_v3, %v884_v58 }
  0xef   :  { %v509_v2 = vrot.slane %v508_v13, 2  ;;  %v167_v41 = vpop.f32.mrf.mxu2 }
  0xf0   :  { %v146_v25 = vpop.f32.mrf.mxu0  ;;  %v158_v50 = vpop.f32.mrf.mxu1 }
  0xf1   :  { %v510_v30 = vmax.f32 %v508_v13, %v509_v2  ;;  %v391_v32 = vmul.f32 %v374_v59, %v146_v25  ;;  %v383_v59 = vadd.f32 %v367_v37, %v300_v36  ;;  %v395_v4 = vmul.f32 %v378_v28, %v158_v50  ;;  %v179_v13 = vpop.f32.mrf.mxu3 }
  0xf2   :  { %v384_v25 = vadd.f32 %v368_v6, %v301_v8  ;;  %v386_v36 = vadd.f32 %v370_v29, %v303_v0 }
  0xf3   :  { %v511_v39 = vrot.slane %v510_v30, 1  ;;  %v406_v40 = vadd.f32 %v405_v31, %v391_v32  ;;  %v385_v32 = vadd.f32 %v369_v24, %v302_v22 }
  0xf4   :  { %v401_v33 = vmul.f32 %v384_v25, %v988_v34 }
  0xf5   :  { %v512_v46 = vmax.f32 %v510_v30, %v511_v39  ;;  %v407_v47 = vadd.f32 %v406_v40, %v392_v10  ;;  %v400_v30 = vmul.f32 %v383_v59, %v956_v48 }
  0xf7   :  { %v1009_v62 = vmax.f32 %v997_v43, %v512_v46  ;;  %v408_v1 = vadd.f32 %v407_v47, %v393_v35  ;;  %v170_v2 = vpop.f32.mrf.mxu2 }
  0xf8   :  { %v399_v28 = vmul.f32 %v382_v53, %v170_v2  ;;  %v514_v53 = vld [vmem:[#allocation3] sm:$0x1] }
  0xf9   :  { %v520_v52 = vperm.slane %v1009_v62, 0  ;;  %593 = vst [vmem:[#allocation2] sm:$0x1] %v1009_v62  ;;  %v409_v17 = vadd.f32 %v408_v1, %v394_v49  ;;  %v182_v38 = vpop.f32.mrf.mxu3  ;;  %v515_v8 = vsub.f32 %v997_v43, %v1009_v62 }
  0xfa   :  { %v403_v27 = vmul.f32 %v386_v36, %v182_v38 }
  0xfb   :  { %v522_v10 = vsub.f32 %v892_v63, %v520_v52  ;;  %v523_v11 = vsub.f32 %v925_v20, %v520_v52  ;;  %v524_v12 = vsub.f32 -1e+30, %v520_v52  ;;  %v410_v16 = vadd.f32 %v409_v17, %v395_v4  ;;  %v387_v4 = vld [vmem:[#allocation4] sm:$0x1] }
  0xfc   :  { %v398_v20 = vmul.f32 %v381_v7, %v167_v41  ;;  %v402_v41 = vmul.f32 %v385_v32, %v179_v13 }
  0xfd   :  { %v538_v19 = vmul.f32 1.442695, %v522_v10  ;;  %v540_v21 = vmul.f32 1.442695, %v523_v11  ;;  %v542_v63 = vmul.f32 1.442695, %v524_v12  ;;  %v411_v23 = vadd.f32 %v410_v16, %v396_v54 }
  0xfe   :  { %v516_v10 = vmul.f32 1.442695, %v515_v8 }
  0xff   :  { %712 = vpow2.f32 %v538_v19  ;;  %v412_v26 = vadd.f32 %v411_v23, %v397_v15 }
 0x100   :  { %714 = vpow2.f32 %v540_v21  ;;  %v597_v62 = vld [vmem:[#allocation2] sm:$0x1] }
 0x101   :  { %716 = vpow2.f32 %v542_v63  ;;  %v413_v31 = vadd.f32 %v412_v26, %v398_v20 }
 0x102   :  { %718 = vpow2.f32 %v516_v10 }
 0x103   :  { %v414_v35 = vadd.f32 %v413_v31, %v399_v28 }
 0x105   :  { %v713_v37 = vpop.eup %712  ;;  %v415_v40 = vadd.f32 %v414_v35, %v400_v30 }
 0x106   :  { %v715_v39 = vpop.eup %714 }
 0x107   :  { %v570_v57 = vadd.f32 %v715_v39, %v713_v37  ;;  %v717_v42 = vpop.eup %716  ;;  %v416_v44 = vadd.f32 %v415_v40, %v401_v33 }
 0x108   :  { %v719_v16 = vpop.eup %718 }
 0x109   :  { %v571_v45 = vadd.f32 %v717_v42, %v570_v57  ;;  %v417_v58 = vadd.f32 %v416_v44, %v402_v41  ;;  %v518_v19 = vmul.f32 %v719_v16, %v514_v53 }
 0x10b   :  { %v572_v46 = vadd.f32 %v717_v42, %v571_v45  ;;  %v418_v47 = vadd.f32 %v417_v58, %v403_v27 }
 0x10d   :  { %v573_v48 = vadd.f32 %v717_v42, %v572_v46  ;;  %v419_v49 = vrot.slane %v418_v47, 4 }
 0x10f   :  { %v574_v50 = vadd.f32 %v717_v42, %v573_v48  ;;  %v420_v51 = vadd.f32 %v419_v49, %v418_v47 }
 0x111   :  { %v575_v34 = vadd.f32 %v717_v42, %v574_v50  ;;  %v421_v54 = vrot.slane %v420_v51, 2 }
 0x113   :  { %v576_v56 = vadd.f32 %v717_v42, %v575_v34  ;;  %v422_v59 = vadd.f32 %v421_v54, %v420_v51 }
 0x115   :  { %v577_v61 = vadd.f32 %v717_v42, %v576_v56  ;;  %v423_v1 = vrot.slane %v422_v59, 1 }
 0x117   :  { %v578_v3 = vadd.f32 %v717_v42, %v577_v61  ;;  %v424_v60 = vadd.f32 %v423_v1, %v422_v59 }
 0x119   :  { %v579_v5 = vadd.f32 %v717_v42, %v578_v3  ;;  %v425_v52 = vadd.f32 %v424_v60, %v387_v4 }
 0x11b   :  { %v580_v17 = vadd.f32 %v717_v42, %v579_v5  ;;  %426 = vst [vmem:[#allocation4] sm:$0x1] %v425_v52 }
 0x11d   :  { %v581_v7 = vadd.f32 %v717_v42, %v580_v17 }
 0x11f   :  { %v582_v6 = vadd.f32 %v717_v42, %v581_v7 }
 0x121   :  { %v583_v9 = vadd.f32 %v717_v42, %v582_v6 }
 0x122   :  { %v602_v23 = vld [vmem:[#allocation4] sm:$0x1] }
 0x123   :  { %v584_v11 = vadd.f32 %v717_v42, %v583_v9 }
 0x125   :  { %v585_v12 = vrot.slane %v584_v11, 4 }
 0x127   :  { %v586_v13 = vadd.f32 %v585_v12, %v584_v11 }
 0x129   :  { %v587_v14 = vrot.slane %v586_v13, 2 }
 0x12b   :  { %v588_v15 = vadd.f32 %v587_v14, %v586_v13 }
 0x12d   :  { %v589_v18 = vrot.slane %v588_v15, 1 }
 0x12f   :  { %v590_v21 = vadd.f32 %v589_v18, %v588_v15 }
 0x131   :  { %v591_v2 = vadd.f32 %v590_v21, %v518_v19 }
 0x133   :  { %592 = vst [vmem:[#allocation3] sm:$0x1] %v591_v2 }
 0x13a   :  { %v598_v22 = vld [vmem:[#allocation3] sm:$0x1] }
 0x13b   :  { %720 = vlog2.f32 %v598_v22 }
 0x141   :  { %v721_v55 = vpop.eup %720 }
 0x142   :  { %v600_v43 = vmul.f32 0.6931472, %v721_v55 }
 0x144   :  { %v601_v63 = vadd.f32 %v600_v43, %v597_v62 }
 0x146   :  { %v603_v20 = vsub.f32 %v601_v63, %v602_v23 }
 0x148   :  { %604 = vst [vmem:[#allocation12] sm:$0x1] %v603_v20 }
 0x149   :  { %615 = dma.vmem_to_hbm [thread:$0]  %s611_s29, 16, %s613_s5, [#allocation7]  }
 0x14a   :  { %812 = dma.done.wait [#allocation7], 16  }
 0x14b   :  { %813 = vsyncadd [#allocation7], 4294967280 }
 0x14c   :  { %620 = vsyncpa [#allocation6], 1 }
 0x14d   :  { %621 = vsyncpa [#allocation11], 1 }
 0x14e   :  { %622 = vsyncpa [#allocation7], 1 }
 0x14f   :  { %623 = vsyncpa [#allocation8], 1 }

</bundles_post_ra>
